<compile_context>
chip_gen: v7x
topology: tpu7x:2x2x1
jax: 0.10.0
libtpu: 0.0.40
codegen_flags: <defaults>
</compile_context>

<pallas_src>
import functools

import jax
import jax.numpy as jnp
from jax import lax
from jax.experimental import pallas as pl
from jax.experimental.pallas import tpu as pltpu


def _round_up(x, n):
    return ((x + n - 1) // n) * n


def _addmargin_kernel(xs_ref, wt_ref, winv_ref, lbl_ref, out_ref, *, sm, tn):
    """One (tm, tn) output tile of s * (cos - m * onehot)."""
    j = pl.program_id(1)

    # (tm, D) @ (D, tn) on the MXU.  `s` is already folded into xs, so this is
    # s * (x_hat . w) before the per-class norm correction.
    cos_s = jnp.dot(xs_ref[...], wt_ref[...], preferred_element_type=jnp.float32)

    # Per-class inverse norm as a (1, tn) column scale -> s * cosine.
    cos_s = cos_s * winv_ref[...]

    # Additive margin on the target class of this C-tile (tile-local compare:
    # shift the (tm, 1) labels instead of the whole (tm, tn) iota).
    lbl_local = lbl_ref[...] - j * tn                       # (tm, 1) int32
    col = lax.broadcasted_iota(jnp.int32, cos_s.shape, 1)   # (tm, tn)
    out_ref[...] = jnp.where(col == lbl_local, cos_s - sm, cos_s)


def _vmem_limit_bytes(tm, tn, d_pad):
    # Double-buffered xs / wt / winv / lbl / out tiles (f32, lane/sublane padded).
    need = 4 * (2 * tm * d_pad + 2 * d_pad * tn + 2 * 8 * tn + 2 * tm * 128 + 2 * tm * tn)
    cap = 48 * 1024 * 1024  # safe on every generation (v7x: 64 MiB per TC)
    try:
        info = pltpu.get_tpu_info()
        cap_bytes = getattr(info, "vmem_capacity_bytes", None)
        if cap_bytes:
            cap = int(cap_bytes * 0.8)
    except Exception:
        pass
    return int(min(max(int(need * 1.5), 32 * 1024 * 1024), cap))


def add_margin_product(x, weight, label, *, s=30.0, m=0.4, tm=512, tn=1024):
    """CosFace margin head. x: (B, D), weight: (C, D), label: (B,) int -> (B, C) f32."""
    B, D = x.shape
    C, _ = weight.shape

    # MXU-sized, lane-dense tiles (shrunk to the problem when it is small).
    tm = min(tm, _round_up(B, 8))
    tn = min(tn, _round_up(C, 128))
    B_pad = _round_up(B, tm)
    C_pad = _round_up(C, tn)
    D_pad = _round_up(D, 128)

    # --- wrapper-side prep (tiny XLA passes, hoisted out of the kernel) ------
    # x_hat * s : F.normalize uses eps=1e-12 on the L2 norm <=> eps^2 under max.
    x32 = x.astype(jnp.float32)
    x_ssq = jnp.sum(x32 * x32, axis=-1, keepdims=True)
    xs = x32 * (float(s) * lax.rsqrt(jnp.maximum(x_ssq, 1e-24)))          # (B, D)

    # Per-class inverse norms + one-time transpose of the weight to (D, C).
    w32 = weight.astype(jnp.float32)
    w_ssq = jnp.sum(w32 * w32, axis=-1)                                    # (C,)
    w_inv = lax.rsqrt(jnp.maximum(w_ssq, 1e-24)).reshape(1, C)             # (1, C)
    w_t = w32.T                                                            # (D, C)

    # Zero padding is benign: padded feature dims contribute 0 to the dot,
    # padded class columns have w_inv padded with 0 (0 * 0 = 0), padded batch
    # rows are all-zero, and padded labels (-1) never match a column index.
    xs_p = xs if (B_pad, D_pad) == (B, D) else jnp.pad(xs, ((0, B_pad - B), (0, D_pad - D)))
    wt_p = w_t if (D_pad, C_pad) == (D, C) else jnp.pad(w_t, ((0, D_pad - D), (0, C_pad - C)))
    winv_p = w_inv if C_pad == C else jnp.pad(w_inv, ((0, 0), (0, C_pad - C)))
    lbl_p = jnp.pad(label.astype(jnp.int32), (0, B_pad - B), constant_values=-1).reshape(B_pad, 1)

    grid = (B_pad // tm, C_pad // tn)
    kernel = functools.partial(_addmargin_kernel, sm=float(s) * float(m), tn=tn)

    out = pl.pallas_call(
        kernel,
        out_shape=jax.ShapeDtypeStruct((B_pad, C_pad), jnp.float32),
        grid_spec=pltpu.PrefetchScalarGridSpec(
            num_scalar_prefetch=0,
            grid=grid,
            in_specs=[
                pl.BlockSpec((tm, D_pad), lambda i, j: (i, 0)),    # x_hat * s   B-tile
                pl.BlockSpec((D_pad, tn), lambda i, j: (0, j)),    # weight^T    C-tile (K, N)
                pl.BlockSpec((1, tn), lambda i, j: (0, j)),        # 1/||w||     C-tile
                pl.BlockSpec((tm, 1), lambda i, j: (i, 0)),        # labels      B-tile
            ],
            out_specs=pl.BlockSpec((tm, tn), lambda i, j: (i, j)),
        ),
        compiler_params=pltpu.CompilerParams(
            # No cross-step carry -> both axes are independent; lets v7x split
            # either axis across its 2 TensorCores.
            dimension_semantics=("parallel", "parallel"),
            vmem_limit_bytes=_vmem_limit_bytes(tm, tn, D_pad),
        ),
    )(xs_p, wt_p, winv_p, lbl_p)

    return out[:B, :C]


def _reference(x, weight, label, s=30.0, m=0.4):
    eps = 1e-12
    xh = x / jnp.maximum(jnp.linalg.norm(x, axis=-1, keepdims=True), eps)
    wh = weight / jnp.maximum(jnp.linalg.norm(weight, axis=-1, keepdims=True), eps)
    cosine = xh @ wh.T
    one_hot = jax.nn.one_hot(label, weight.shape[0], dtype=cosine.dtype)
    return (one_hot * (cosine - m) + (1.0 - one_hot) * cosine) * s


if __name__ == "__main__":
    # Module config (synthetic, deterministic init)
    in_features = 32
    out_features = 16
    batch = 8
    s_val, m_val = 30.0, 0.4

    key = jax.random.PRNGKey(0)
    kx, kw, kl = jax.random.split(key, 3)

    x = jax.random.normal(kx, (batch, in_features), dtype=jnp.float32)
    # Xavier-uniform init for weight (out_features, in_features)
    bound = (6.0 / (in_features + out_features)) ** 0.5
    weight = jax.random.uniform(
        kw, (out_features, in_features), minval=-bound, maxval=bound, dtype=jnp.float32
    )
    label = jax.random.randint(kl, (batch,), 0, out_features, dtype=jnp.int32)

    out = add_margin_product(x, weight, label, s=s_val, m=m_val)
    out = jax.block_until_ready(out)

    ref = _reference(x, weight, label, s=s_val, m=m_val)
    assert out.shape == (batch, out_features)
    assert jnp.allclose(out, ref, atol=1e-4, rtol=1e-4), "mismatch vs reference"
    print("KERNEL_OK")
</pallas_src>

<mosaic_0001>
module attributes {stable_mosaic.version = 11 : i64} {
  func.func @_addmargin_kernel(%arg0: i32, %arg1: i32, %arg2: memref<8x128xf32, #tpu.memory_space<vmem>>, %arg3: memref<128x128xf32, #tpu.memory_space<vmem>>, %arg4: memref<1x128xf32, #tpu.memory_space<vmem>>, %arg5: memref<8x1xi32, #tpu.memory_space<vmem>>, %arg6: memref<8x128xf32, #tpu.memory_space<vmem>>) attributes {dimension_semantics = [#tpu.dimension_semantics<parallel>, #tpu.dimension_semantics<parallel>], iteration_bounds = array<i64: 1, 1>, scalar_prefetch = 0 : i64, scratch_operands = 0 : i64, tpu.core_type = #tpu.core_type<tc>, window_params = [{transform_indices = @transform_0, window_bounds = array<i64: 8, 128>}, {transform_indices = @transform_1, window_bounds = array<i64: 128, 128>}, {transform_indices = @transform_2, window_bounds = array<i64: 1, 128>}, {transform_indices = @transform_3, window_bounds = array<i64: 8, 1>}, {transform_indices = @transform_4, window_bounds = array<i64: 8, 128>}]} {
    %c0 = arith.constant 0 : index
    %c0_0 = arith.constant 0 : index
    %0 = vector.load %arg2[%c0, %c0_0] : memref<8x128xf32, #tpu.memory_space<vmem>>, vector<8x128xf32>
    %c0_1 = arith.constant 0 : index
    %c0_2 = arith.constant 0 : index
    %1 = vector.load %arg3[%c0_1, %c0_2] : memref<128x128xf32, #tpu.memory_space<vmem>>, vector<128x128xf32>
    %cst = arith.constant dense<0.000000e+00> : vector<8x128xf32>
    %2 = tpu.matmul %0, %1, %cst {dimension_numbers = #tpu.dot_dimension_numbers<[1], [0], [0], [1], [0, 0, 1, 1], [], []>} : vector<8x128xf32>, vector<128x128xf32>, vector<8x128xf32> -> vector<8x128xf32>
    %c0_3 = arith.constant 0 : index
    %c0_4 = arith.constant 0 : index
    %3 = vector.load %arg4[%c0_3, %c0_4] : memref<1x128xf32, #tpu.memory_space<vmem>>, vector<1x128xf32>
    %4 = vector.broadcast %3 : vector<1x128xf32> to vector<8x128xf32>
    %5 = arith.mulf %2, %4 : vector<8x128xf32>
    %c0_5 = arith.constant 0 : index
    %c0_6 = arith.constant 0 : index
    %6 = vector.load %arg5[%c0_5, %c0_6] : memref<8x1xi32, #tpu.memory_space<vmem>>, vector<8x1xi32>
    %c128_i32 = arith.constant 128 : i32
    %7 = arith.muli %arg1, %c128_i32 : i32
    %8 = vector.broadcast %7 : i32 to vector<8x1xi32>
    %9 = arith.subi %6, %8 : vector<8x1xi32>
    %10 = tpu.iota {dimensions = array<i32: 1>} : vector<8x128xi32>
    %11 = vector.broadcast %9 : vector<8x1xi32> to vector<8x128xi32>
    %12 = arith.cmpi eq, %10, %11 : vector<8x128xi32>
    %cst_7 = arith.constant 1.200000e+01 : f32
    %13 = vector.broadcast %cst_7 : f32 to vector<8x128xf32>
    %14 = arith.subf %5, %13 : vector<8x128xf32>
    %15 = arith.select %12, %14, %5 : vector<8x128xi1>, vector<8x128xf32>
    %c0_8 = arith.constant 0 : index
    %c0_9 = arith.constant 0 : index
    %16 = vector.load %arg6[%c0_8, %c0_9] : memref<8x128xf32, #tpu.memory_space<vmem>>, vector<8x128xf32>
    tpu.vector_store %arg6[%c0_8, %c0_9], %15 {strides = array<i32>} : memref<8x128xf32, #tpu.memory_space<vmem>>, vector<8x128xf32>,
    return
  }
  func.func @transform_0(%arg0: i32, %arg1: i32) -> (i32, i32) {
    %c0_i32 = arith.constant 0 : i32
    %c0_i32_0 = arith.constant 0 : i32
    return %arg0, %c0_i32 : i32, i32
  }
  func.func @transform_1(%arg0: i32, %arg1: i32) -> (i32, i32) {
    %c0_i32 = arith.constant 0 : i32
    %c0_i32_0 = arith.constant 0 : i32
    return %c0_i32, %arg1 : i32, i32
  }
  func.func @transform_2(%arg0: i32, %arg1: i32) -> (i32, i32) {
    %c0_i32 = arith.constant 0 : i32
    %c0_i32_0 = arith.constant 0 : i32
    return %c0_i32, %arg1 : i32, i32
  }
  func.func @transform_3(%arg0: i32, %arg1: i32) -> (i32, i32) {
    %c0_i32 = arith.constant 0 : i32
    %c0_i32_0 = arith.constant 0 : i32
    return %arg0, %c0_i32 : i32, i32
  }
  func.func @transform_4(%arg0: i32, %arg1: i32) -> (i32, i32) {
    %c0_i32 = arith.constant 0 : i32
    return %arg0, %arg1 : i32, i32
  }
}

</mosaic_0001>

<bundles_post_ra>
// kernel: tpu_custom_call.1
= control target key start
LH: loop header
LB: loop body
LE: loop exit
PB: predicated region body
PF: predicated region fallthrough
CT: control target
= control target key end

     0   :  { %9 = vsyncpa [#allocation3], 0  ;;  %s356_s0 = inlined_call_operand.vmem [shape: f32[8,128], index: 0, kind: input, shape index: {}]   ;;  %s357_s1 = inlined_call_operand.hbm [shape: f32[128,128], index: 1, kind: input, shape index: {}]   ;;  %s358_s2 = inlined_call_operand.vmem [shape: f32[1,128], index: 2, kind: input, shape index: {}]   ;;  %s359_s3 = inlined_call_operand.vmem [shape: s32[8,1], index: 3, kind: input, shape index: {}]   ;;  %s360_s4 = inlined_call_operand.hbm [shape: f32[8,128], index: 4, kind: output, shape index: {}]  }
   0x1   :  { %10 = vsyncpa [#allocation4], 0  ;;  %s290_s15 = smov [#allocation2]   ;;  %s242_s19 = scalar_lea.hbm %s357_s1, 2048 }
   0x2   :  { %s18_s16 = sshll.u32 %s290_s15, 4  ;;  %p243_p0 = scmp.ne.s32.totalorder %s357_s1, %s242_s19  ;;  %s19_s16 = int_to_ptr.vmem [resolvable:$true] %s18_s16 }
   0x3   :  { %p246_p1 = scmp.lt.u32.totalorder %s242_s19, %s357_s1 }
   0x5   :  { %p248_p2 = pnand %p246_p1, %p243_p0 }
   0x7   :  { %251 = shalt.err (!%p248_p2)
}
   0x8   :  { %s252_s24 = scalar_lea.vmem %s19_s16, 2048  ;;  %p257_p4 = scmp.lt.s32.totalorder %s19_s16, %s19_s16 }
   0x9   :  { %p253_p3 = scmp.ne.s32.totalorder %s19_s16, %s252_s24  ;;  %p258_p5 = scmp.lt.s32.totalorder %s252_s24, %s252_s24 }
   0xb   :  { %p259_p6 = por %p258_p5, %p257_p4 }
   0xd   :  { %p260_p7 = pnand %p259_p6, %p253_p3 }
   0xf   :  { %263 = shalt.err (!%p260_p7)
}
  0x10   :  { %s291_s25 = smov 128   ;;  %s292_s26 = smov 8  }
  0x11   :  { %24 = dma.hbm_to_vmem [thread:$0]  %s357_s1, 2048, %s19_s16, [#allocation3], %s291_s25, %s291_s25, %s292_s26  }
  0x12   :  { %286 = dma.done.wait [#allocation3], 2048  }
  0x13   :  { %287 = vsyncadd [#allocation3], 4294965248  ;;  %v293_v0 = vmov 0.0|0.0   ;;  %vm294_vm0 = vmmov 0   ;;  %v295_v1 = vmov 0.0   ;;  %v296_v2 = vmov 0  }
  0x14   :  { %209 = vmatprep.subr.bf16.mxu0 %v293_v0  ;;  %206 = vmatprep.mubr.msk.f32.mxu0 %vm294_vm0, %v295_v1  ;;  %v33_v3 = vld [vmem:[#allocation2] sm:$0xff]  ;;  %v34_v4 = vld [vmem:[#allocation2 + $0x8] sm:$0xff]  ;;  %v35_v5 = vld [vmem:[#allocation2 + $0x10] sm:$0xff]  ;;  %v131_v29 = vlaneseq  ;;  %s297_s7 = smov [#allocation5]  }
  0x15   :  { %241 = vset.pattern.permute.xlu0 %v296_v2  ;;  %v210_v6 = vpack.c.bf16 %v34_v4, %v33_v3  ;;  %v36_v7 = vld [vmem:[#allocation2 + $0x18] sm:$0xff]  ;;  %v37_v9 = vld [vmem:[#allocation2 + $0x20] sm:$0xff]  ;;  %v38_v10 = vld [vmem:[#allocation2 + $0x28] sm:$0xff]  ;;  %s146_s8 = sshll.u32 %s297_s7, 4  ;;  %s147_s8 = int_to_ptr.vmem [resolvable:$true] %s146_s8 }
  0x16   :  { %v213_v8 = vpack.c.bf16 %v36_v7, %v35_v5  ;;  %v127_v11 = vld [vmem:[%s359_s3] sm:$0xff]  ;;  %v216_v12 = vpack.c.bf16 %v38_v10, %v37_v9  ;;  %v39_v13 = vld [vmem:[#allocation2 + $0x30] sm:$0xff]  ;;  %v40_v14 = vld [vmem:[#allocation2 + $0x38] sm:$0xff]  ;;  %v132_v31 = vand.u32 127, %v131_v29  ;;  %s264_s9 = scalar_lea.vmem %s147_s8, 128  ;;  %p269_p9 = scmp.lt.s32.totalorder %s147_s8, %s147_s8 }
  0x17   :  { %211 = vmatpush3.bf16.msra.mxu0 %v210_v6  ;;  %134 = vperm.xlu0 %241, %v127_v11   ;;  %v219_v15 = vpack.c.bf16 %v40_v14, %v39_v13  ;;  %v41_v16 = vld [vmem:[#allocation2 + $0x40] sm:$0xff]  ;;  %v42_v17 = vld [vmem:[#allocation2 + $0x48] sm:$0xff]  ;;  %v43_v19 = vld [vmem:[#allocation2 + $0x50] sm:$0xff]  ;;  %p265_p8 = scmp.ne.s32.totalorder %s147_s8, %s264_s9  ;;  %p270_p10 = scmp.lt.s32.totalorder %s264_s9, %s264_s9 }
  0x18   :  { %212 = vmatprep.subr.bf16.mxu0 %v293_v0  ;;  %v222_v18 = vpack.c.bf16 %v42_v17, %v41_v16  ;;  %v44_v20 = vld [vmem:[#allocation2 + $0x58] sm:$0xff]  ;;  %v45_v22 = vld [vmem:[#allocation2 + $0x60] sm:$0xff]  ;;  %v46_v23 = vld [vmem:[#allocation2 + $0x68] sm:$0xff] }
  0x19   :  { %v225_v21 = vpack.c.bf16 %v44_v20, %v43_v19  ;;  %v228_v24 = vpack.c.bf16 %v46_v23, %v45_v22  ;;  %v47_v25 = vld [vmem:[#allocation2 + $0x70] sm:$0xff]  ;;  %v48_v26 = vld [vmem:[#allocation2 + $0x78] sm:$0xff]  ;;  %v32_v28 = vld [vmem:[%s356_s0] sm:$0xff]  ;;  %p271_p11 = por %p270_p10, %p269_p9 }
  0x1a   :  { %v231_v27 = vpack.c.bf16 %v48_v26, %v47_v25  ;;  %v155_v30 = vld [vmem:[%s358_s2] ss:$0 sm:$0xff] }
  0x1b   :  { %214 = vmatpush3.bf16.msra.mxu0 %v213_v8  ;;  %p272_p12 = pnand %p271_p11, %p265_p8 }
  0x1c   :  { %215 = vmatprep.subr.bf16.mxu0 %v293_v0 }
  0x1f   :  { %217 = vmatpush3.bf16.msra.mxu0 %v216_v12 }
  0x20   :  { %218 = vmatprep.subr.bf16.mxu0 %v293_v0 }
  0x23   :  { %220 = vmatpush3.bf16.msra.mxu0 %v219_v15 }
  0x24   :  { %221 = vmatprep.subr.bf16.mxu0 %v293_v0 }
  0x27   :  { %223 = vmatpush3.bf16.msra.mxu0 %v222_v18 }
  0x28   :  { %224 = vmatprep.subr.bf16.mxu0 %v293_v0 }
  0x2b   :  { %226 = vmatpush3.bf16.msra.mxu0 %v225_v21 }
  0x2c   :  { %227 = vmatprep.subr.bf16.mxu0 %v293_v0 }
  0x2f   :  { %229 = vmatpush3.bf16.msra.mxu0 %v228_v24 }
  0x30   :  { %230 = vmatprep.subr.bf16.mxu0 %v293_v0 }
  0x33   :  { %232 = vmatpush3.bf16.msra.mxu0 %v231_v27 }
  0x36   :  { %207 = vmatmul.mubr.f32.vlgmr.msra.gmra.mrb[0].mxu0 %v32_v28 }
  0x96   :  { %v135_v32 = vpop.permute.xlu0 %134 }
  0x97   :  { %vm136_vm1 = vcmp.eq.s32.totalorder %v132_v31, %v135_v32 }
 0x109   :  { %v115_v33 = vpop.f32.mrb[0].mxu0 }
 0x10a   :  { %v126_v34 = vmul.f32 %v155_v30, %v115_v33  ;;  %v208_v35 = vpop.f32.mrb[1].mxu0 }
 0x10c   :  { %v156_v36 = vadd.f32 -12.0, %v126_v34 }
 0x10e   :  { %v138_v37 = vsel %vm136_vm1, %v156_v36, %v126_v34 }
 0x10f   :  { %139 = vst [vmem:[#allocation5] sm:$0xff] %v138_v37 }
 0x110   :  { %275 = shalt.err (!%p272_p12)
}
 0x111   :  { %s276_s10 = scalar_lea.hbm %s360_s4, 128 }
 0x112   :  { %p277_p13 = scmp.ne.s32.totalorder %s360_s4, %s276_s10  ;;  %p280_p0 = scmp.lt.u32.totalorder %s276_s10, %s360_s4 }
 0x114   :  { %p282_p1 = pnand %p280_p0, %p277_p13 }
 0x116   :  { %285 = shalt.err (!%p282_p1)
}
 0x117   :  { %149 = dma.vmem_to_hbm [thread:$0]  %s147_s8, 128, %s360_s4, [#allocation4]  }
 0x118   :  { %288 = dma.done.wait [#allocation4], 128  }
 0x119   :  { %289 = vsyncadd [#allocation4], 4294967168 }
 0x11a   :  { %153 = vsyncpa [#allocation3], 1 }
 0x11b   :  { %154 = vsyncpa [#allocation4], 1 }

</bundles_post_ra>
